<compile_context>
chip_gen: v7x
topology: tpu7x:2x2x1
jax: 0.10.0
libtpu: 0.0.40
codegen_flags: <defaults>
</compile_context>

<pallas_src>
import math

import jax
import jax.numpy as jnp
from jax.experimental import pallas as pl
from jax.experimental.pallas import tpu as pltpu


def lora_linear_kernel(x_ref, wt_ref, b_ref, a_ref, bt_ref, o_ref):
    # x_ref : (tm, F)   tile of flattened input rows
    # wt_ref: (F, tn)   frozen linear weight column-tile, already transposed
    # b_ref : (1, tn)   bias tile
    # a_ref : (F, R)    LoRA factor A (grid-constant)
    # bt_ref: (R, tn)   LoRA factor B^T tile with `scale` pre-folded in
    x = x_ref[...]
    acc = jnp.dot(x, wt_ref[...], preferred_element_type=jnp.float32)
    acc = acc + b_ref[...]                                  # broadcast (1, tn)
    xa = jnp.dot(x, a_ref[...], preferred_element_type=jnp.float32)
    acc = acc + jnp.dot(xa.astype(bt_ref.dtype), bt_ref[...],
                        preferred_element_type=jnp.float32)
    o_ref[...] = acc.astype(o_ref.dtype)                    # single epilogue store


def _round_up(x, m):
    return ((x + m - 1) // m) * m


def prepare_lora_params(w, bias, a, b_fac, scale):
    """One-time preparation (call outside the per-forward hot path).

    W is frozen and B is tiny, so transposing them (and folding `scale` into
    B^T) here avoids a full HBM read+write of the largest tensor every call
    and removes a VPU multiply from the kernel epilogue.
    """
    wt = jnp.asarray(w).T                                   # (F, O)
    bias2d = jnp.asarray(bias).reshape(1, -1)               # (1, O)
    bt_scaled = (scale * jnp.asarray(b_fac)).T              # (R, O)
    return wt, bias2d, jnp.asarray(a), bt_scaled


def lora_linear(x2d, wt, bias2d, a, bt_scaled, *,
                tm=256, tn=512, vmem_limit_bytes=48 * 1024 * 1024):
    """Fused LoRA linear.

    x2d: (M, F) flattened activations; wt: (F, O); bias2d: (1, O);
    a: (F, R); bt_scaled: (R, O) with scale already folded in.
    Operands may be bf16 on v6e/v7x; accumulation is always f32.
    """
    M, F = x2d.shape
    O = wt.shape[1]
    R = a.shape[1]
    assert wt.shape == (F, O) and bias2d.shape == (1, O)
    assert a.shape == (F, R) and bt_scaled.shape == (R, O)

    # ---- tile selection -------------------------------------------------
    # Output tile: large multiple of 128/256 lanes when O divides evenly,
    # otherwise keep the full (small or odd) output dim as one lane-dense tile.
    tn_eff = tn if (O >= tn and O % tn == 0) else O
    # Row tile: as big as possible (MXU row utilization + fewer grid steps),
    # clamped for tiny inputs; pad ragged M with zero rows and slice afterwards.
    tm_eff = min(tm, _round_up(M, 8))
    m_pad = _round_up(M, tm_eff)
    if m_pad != M:
        x2d = jnp.pad(x2d, ((0, m_pad - M), (0, 0)))

    grid = (m_pad // tm_eff, O // tn_eff)

    out = pl.pallas_call(
        lora_linear_kernel,
        out_shape=jax.ShapeDtypeStruct((m_pad, O), x2d.dtype),
        grid_spec=pltpu.PrefetchScalarGridSpec(
            num_scalar_prefetch=0,
            grid=grid,
            in_specs=[
                pl.BlockSpec((tm_eff, F), lambda i, j: (i, 0)),   # x row-tile
                pl.BlockSpec((F, tn_eff), lambda i, j: (0, j)),   # Wt col-tile
                pl.BlockSpec((1, tn_eff), lambda i, j: (0, j)),   # bias tile
                pl.BlockSpec((F, R), lambda i, j: (0, 0)),        # A (resident)
                pl.BlockSpec((R, tn_eff), lambda i, j: (0, j)),   # scaled Bt tile
            ],
            out_specs=pl.BlockSpec((tm_eff, tn_eff), lambda i, j: (i, j)),
        ),
        compiler_params=pltpu.CompilerParams(
            dimension_semantics=("parallel", "parallel"),
            vmem_limit_bytes=vmem_limit_bytes,
        ),
    )(x2d, wt, bias2d, a, bt_scaled)

    return out[:M] if m_pad != M else out


if __name__ == "__main__":
    # Small shapes consistent with the module: batch=2, seq=8, hidden=32, rank=4.
    B, S, F, O, R = 2, 8, 32, 32, 4
    scale_param = 1.0
    scale = scale_param / R                      # self.scale = scale / rank

    key = jax.random.PRNGKey(0)
    kx, kw, kb, ka, kfb = jax.random.split(key, 5)

    x = jax.random.normal(kx, (B, S, F), jnp.float32)

    # Deterministic init mirroring torch.nn.Linear + LoRA reset_parameters:
    #   W, bias ~ U(-1/sqrt(in_features), 1/sqrt(in_features))
    #   A ~ kaiming_uniform(a=sqrt(5)) -> U(-1/sqrt(rank), 1/sqrt(rank))
    #   B = zeros
    bw = 1.0 / math.sqrt(F)
    w = jax.random.uniform(kw, (O, F), jnp.float32, -bw, bw)
    bias = jax.random.uniform(kb, (O,), jnp.float32, -bw, bw)
    ba = 1.0 / math.sqrt(R)
    a_fac = jax.random.uniform(ka, (F, R), jnp.float32, -ba, ba)
    b_zero = jnp.zeros((O, R), jnp.float32)      # faithful to module init
    b_rand = jax.random.uniform(kfb, (O, R), jnp.float32, -ba, ba)  # exercise LoRA path

    x2d = x.reshape(B * S, F)

    for b_fac in (b_zero, b_rand):
        wt, bias2d, a_p, bt_scaled = prepare_lora_params(w, bias, a_fac, b_fac, scale)
        out2d = lora_linear(x2d, wt, bias2d, a_p, bt_scaled)
        jax.block_until_ready(out2d)

        # Pure-JAX reference for correctness.
        ref = x2d @ w.T + bias[None, :] + scale * ((x2d @ a_fac) @ b_fac.T)
        assert jnp.allclose(out2d, ref, atol=1e-5, rtol=1e-5), "mismatch vs reference"

    out = out2d.reshape(B, S, O)
    jax.block_until_ready(out)
    print("KERNEL_OK")
</pallas_src>

<mosaic_0001>
module attributes {stable_mosaic.version = 11 : i64} {
  func.func @lora_linear_kernel(%arg0: i32, %arg1: i32, %arg2: memref<16x32xf32, #tpu.memory_space<vmem>>, %arg3: memref<32x32xf32, #tpu.memory_space<vmem>>, %arg4: memref<1x32xf32, #tpu.memory_space<vmem>>, %arg5: memref<32x4xf32, #tpu.memory_space<vmem>>, %arg6: memref<4x32xf32, #tpu.memory_space<vmem>>, %arg7: memref<16x32xf32, #tpu.memory_space<vmem>>) attributes {dimension_semantics = [#tpu.dimension_semantics<parallel>, #tpu.dimension_semantics<parallel>], iteration_bounds = array<i64: 1, 1>, scalar_prefetch = 0 : i64, scratch_operands = 0 : i64, tpu.core_type = #tpu.core_type<tc>, window_params = [{transform_indices = @transform_0, window_bounds = array<i64: 16, 32>}, {transform_indices = @transform_1, window_bounds = array<i64: 32, 32>}, {transform_indices = @transform_2, window_bounds = array<i64: 1, 32>}, {pipeline_mode = #tpu.pipeline_mode<synchronous>, transform_indices = @transform_3, window_bounds = array<i64: 32, 4>}, {transform_indices = @transform_4, window_bounds = array<i64: 4, 32>}, {transform_indices = @transform_5, window_bounds = array<i64: 16, 32>}]} {
    %c0 = arith.constant 0 : index
    %c0_0 = arith.constant 0 : index
    %0 = vector.load %arg2[%c0, %c0_0] : memref<16x32xf32, #tpu.memory_space<vmem>>, vector<16x32xf32>
    %c0_1 = arith.constant 0 : index
    %c0_2 = arith.constant 0 : index
    %1 = vector.load %arg3[%c0_1, %c0_2] : memref<32x32xf32, #tpu.memory_space<vmem>>, vector<32x32xf32>
    %cst = arith.constant dense<0.000000e+00> : vector<16x32xf32>
    %2 = tpu.matmul %0, %1, %cst {dimension_numbers = #tpu.dot_dimension_numbers<[1], [0], [0], [1], [0, 0, 1, 1], [], []>} : vector<16x32xf32>, vector<32x32xf32>, vector<16x32xf32> -> vector<16x32xf32>
    %c0_3 = arith.constant 0 : index
    %c0_4 = arith.constant 0 : index
    %3 = vector.load %arg4[%c0_3, %c0_4] : memref<1x32xf32, #tpu.memory_space<vmem>>, vector<1x32xf32>
    %4 = vector.broadcast %3 : vector<1x32xf32> to vector<16x32xf32>
    %5 = arith.addf %2, %4 : vector<16x32xf32>
    %c0_5 = arith.constant 0 : index
    %c0_6 = arith.constant 0 : index
    %6 = vector.load %arg5[%c0_5, %c0_6] : memref<32x4xf32, #tpu.memory_space<vmem>>, vector<32x4xf32>
    %cst_7 = arith.constant dense<0.000000e+00> : vector<16x4xf32>
    %7 = tpu.matmul %0, %6, %cst_7 {dimension_numbers = #tpu.dot_dimension_numbers<[1], [0], [0], [1], [0, 0, 1, 1], [], []>} : vector<16x32xf32>, vector<32x4xf32>, vector<16x4xf32> -> vector<16x4xf32>
    %c0_8 = arith.constant 0 : index
    %c0_9 = arith.constant 0 : index
    %8 = vector.load %arg6[%c0_8, %c0_9] : memref<4x32xf32, #tpu.memory_space<vmem>>, vector<4x32xf32>
    %cst_10 = arith.constant dense<0.000000e+00> : vector<16x32xf32>
    %9 = tpu.matmul %7, %8, %cst_10 {dimension_numbers = #tpu.dot_dimension_numbers<[1], [0], [0], [1], [0, 0, 1, 1], [], []>} : vector<16x4xf32>, vector<4x32xf32>, vector<16x32xf32> -> vector<16x32xf32>
    %10 = arith.addf %5, %9 : vector<16x32xf32>
    %c0_11 = arith.constant 0 : index
    %c0_12 = arith.constant 0 : index
    %11 = vector.load %arg7[%c0_11, %c0_12] : memref<16x32xf32, #tpu.memory_space<vmem>>, vector<16x32xf32>
    tpu.vector_store %arg7[%c0_11, %c0_12], %10 {strides = array<i32>} : memref<16x32xf32, #tpu.memory_space<vmem>>, vector<16x32xf32>,
    return
  }
  func.func @transform_0(%arg0: i32, %arg1: i32) -> (i32, i32) {
    %c0_i32 = arith.constant 0 : i32
    %c0_i32_0 = arith.constant 0 : i32
    return %arg0, %c0_i32 : i32, i32
  }
  func.func @transform_1(%arg0: i32, %arg1: i32) -> (i32, i32) {
    %c0_i32 = arith.constant 0 : i32
    %c0_i32_0 = arith.constant 0 : i32
    return %c0_i32, %arg1 : i32, i32
  }
  func.func @transform_2(%arg0: i32, %arg1: i32) -> (i32, i32) {
    %c0_i32 = arith.constant 0 : i32
    %c0_i32_0 = arith.constant 0 : i32
    return %c0_i32, %arg1 : i32, i32
  }
  func.func @transform_3(%arg0: i32, %arg1: i32) -> (i32, i32) {
    %c0_i32 = arith.constant 0 : i32
    %c0_i32_0 = arith.constant 0 : i32
    %c0_i32_1 = arith.constant 0 : i32
    return %c0_i32, %c0_i32_0 : i32, i32
  }
  func.func @transform_4(%arg0: i32, %arg1: i32) -> (i32, i32) {
    %c0_i32 = arith.constant 0 : i32
    %c0_i32_0 = arith.constant 0 : i32
    return %c0_i32, %arg1 : i32, i32
  }
  func.func @transform_5(%arg0: i32, %arg1: i32) -> (i32, i32) {
    %c0_i32 = arith.constant 0 : i32
    return %arg0, %arg1 : i32, i32
  }
}

</mosaic_0001>

<bundles_post_ra>
// kernel: tpu_custom_call.1
= control target key start
LH: loop header
LB: loop body
LE: loop exit
PB: predicated region body
PF: predicated region fallthrough
CT: control target
= control target key end

     0   :  { %10 = vsyncpa [#allocation3], 0  ;;  %s539_s0 = inlined_call_operand.hbm [shape: f32[16,32], index: 0, kind: input, shape index: {}]   ;;  %s540_s1 = inlined_call_operand.vmem [shape: f32[32,32], index: 1, kind: input, shape index: {}]   ;;  %s541_s2 = inlined_call_operand.vmem [shape: f32[1,32], index: 2, kind: input, shape index: {}]   ;;  %s542_s3 = inlined_call_operand.vmem [shape: f32[32,4], index: 3, kind: input, shape index: {}]   ;;  %s543_s4 = inlined_call_operand.vmem [shape: f32[4,32], index: 4, kind: input, shape index: {}]   ;;  %s544_s5 = inlined_call_operand.hbm [shape: f32[16,32], index: 5, kind: output, shape index: {}]  }
   0x1   :  { %11 = vsyncpa [#allocation4], 0  ;;  %s439_s18 = smov [#allocation2]   ;;  %s391_s22 = scalar_lea.hbm %s539_s0, 256 }
   0x2   :  { %s17_s19 = sshll.u32 %s439_s18, 4  ;;  %p392_p0 = scmp.ne.s32.totalorder %s539_s0, %s391_s22  ;;  %s18_s19 = int_to_ptr.vmem [resolvable:$true] %s17_s19 }
   0x3   :  { %p395_p1 = scmp.lt.u32.totalorder %s391_s22, %s539_s0 }
   0x5   :  { %p397_p2 = pnand %p395_p1, %p392_p0 }
   0x7   :  { %400 = shalt.err (!%p397_p2)
}
   0x8   :  { %s401_s27 = scalar_lea.vmem %s18_s19, 256  ;;  %p406_p4 = scmp.lt.s32.totalorder %s18_s19, %s18_s19 }
   0x9   :  { %p402_p3 = scmp.ne.s32.totalorder %s18_s19, %s401_s27  ;;  %p407_p5 = scmp.lt.s32.totalorder %s401_s27, %s401_s27 }
   0xb   :  { %p408_p6 = por %p407_p5, %p406_p4 }
   0xd   :  { %p409_p7 = pnand %p408_p6, %p402_p3 }
   0xf   :  { %412 = shalt.err (!%p409_p7)
}
  0x10   :  { %s440_s28 = smov 128   ;;  %s441_s29 = smov 8  }
  0x11   :  { %23 = dma.hbm_to_vmem [thread:$0]  %s539_s0, 256, %s18_s19, [#allocation3], %s440_s28, %s440_s28, %s441_s29  }
  0x12   :  { %435 = dma.done.wait [#allocation3], 256  }
  0x13   :  { %436 = vsyncadd [#allocation3], 4294967040  ;;  %vm48_vm0 = vcmask 261120   ;;  %v130_v0 = vld [vmem:[%s542_s3] sm:$0xff]  ;;  %v131_v1 = vld [vmem:[%s542_s3 + $0x8] sm:$0xff]  ;;  %vm217_vm1 = vcmask 1043456  }
  0x14   :  { %v132_v2 = vld [vmem:[%s542_s3 + $0x10] sm:$0xff]  ;;  %v375_v3 = vpack.c.bf16 %v131_v1, %v130_v0  ;;  %v133_v4 = vld [vmem:[%s542_s3 + $0x18] sm:$0xff]  ;;  %v35_v5 = vld [vmem:[#allocation2] sm:$0xff]  ;;  %vm210_vm2 = vcmask 31744   ;;  %s442_s24 = smov [#allocation5]  }
  0x15   :  { %v379_v6 = vpack.c.bf16 %v133_v4, %v132_v2  ;;  %359 = vmatprep.mubr.msk.f32.mxu1 %vm48_vm0, %v35_v5  ;;  %v37_v7 = vld [vmem:[%s540_s1] sm:$0xff]  ;;  %v38_v8 = vld [vmem:[%s540_s1 + $0x8] sm:$0xff]  ;;  %v39_v9 = vld [vmem:[%s540_s1 + $0x10] sm:$0xff]  ;;  %348 = vmatprep.mubr.msk.f32.mxu0 %vm48_vm0, %v35_v5  ;;  %s305_s25 = sshll.u32 %s442_s24, 4  ;;  %s306_s25 = int_to_ptr.vmem [resolvable:$true] %s305_s25 }
  0x16   :  { %376 = vmatprep.subr.bf16.mxu1 %v375_v3  ;;  %v367_v10 = vpack.c.bf16 %v38_v8, %v37_v7  ;;  %v40_v11 = vld [vmem:[%s540_s1 + $0x18] sm:$0xff]  ;;  %v36_v13 = vld [vmem:[#allocation2 + $0x8] sm:$0xff]  ;;  %v209_v14 = vld [vmem:[%s543_s4] sm:$0xf]  ;;  %s413_s4 = scalar_lea.vmem %s306_s25, 256  ;;  %p418_p9 = scmp.lt.s32.totalorder %s306_s25, %s306_s25 }
  0x17   :  { %378 = vmatpush3.bf16.msra.mxu1 %v375_v3  ;;  %v371_v12 = vpack.c.bf16 %v40_v11, %v39_v9  ;;  %v317_v17 = vld [vmem:[%s541_s2] ss:$0 sm:$0xff]  ;;  %p414_p8 = scmp.ne.s32.totalorder %s306_s25, %s413_s4  ;;  %p419_p10 = scmp.lt.s32.totalorder %s413_s4, %s413_s4 }
  0x18   :  { %380 = vmatprep.subr.bf16.mxu1 %v379_v6  ;;  %368 = vmatprep.subr.bf16.mxu0 %v367_v10 }
  0x19   :  { %370 = vmatpush3.bf16.msra.mxu0 %v367_v10  ;;  %p420_p11 = por %p419_p10, %p418_p9 }
  0x1a   :  { %372 = vmatprep.subr.bf16.mxu0 %v371_v12 }
  0x1b   :  { %382 = vmatpush3.bf16.msra.mxu1 %v379_v6  ;;  %p421_p12 = pnand %p420_p11, %p414_p8 }
  0x1d   :  { %374 = vmatpush3.bf16.msra.mxu0 %v371_v12 }
  0x1e   :  { %360 = vmatmul.mubr.msk.f32.vlgmr.msra.gmra.mrb[0].mxu1 %vm48_vm0, %v36_v13  ;;  %362 = vmatprep.subr.msk.mxu0 %vm217_vm1, %v209_v14 }
  0x20   :  { %349 = vmatmul.mubr.msk.f32.vlgmr.msra.gmra.mrb[0].mxu0 %vm48_vm0, %v36_v13 }
  0x21   :  { %363 = vmatpush3.msk.msra.mxu0 %vm217_vm1, %v209_v14 }
  0xf1   :  { %v361_v15 = vpop.f32.mrb[0].mxu1 }
  0xf2   :  { %v200_v16 = vpop.f32.mrb[1].mxu1 }
  0xf3   :  { %364 = vmatprep.mubr.msk.f32.mxu0 %vm210_vm2, %v200_v16 }
  0xf4   :  { %365 = vmatmul.mubr.msk.f32.vlgmr.msra.gmra.mrb[0].mxu0 %vm210_vm2, %v361_v15 }
 0x1c7   :  { %v366_v18 = vpop.f32.mrb[0].mxu0 }
 0x1c8   :  { %v383_v19 = vadd.f32 %v366_v18, %v317_v17  ;;  %v287_v20 = vpop.f32.mrb[1].mxu0 }
 0x1c9   :  { %v384_v21 = vadd.f32 %v317_v17, %v287_v20 }
 0x1ca   :  { %299 = vst.msk [vmem:[#allocation5 + $0x8] sm:$0xff] %vm48_vm0, %v383_v19 }
 0x1cb   :  { %298 = vst.msk [vmem:[#allocation5] sm:$0xff] %vm48_vm0, %v384_v21 }
 0x1cc   :  { %424 = shalt.err (!%p421_p12)
}
 0x1cd   :  { %s425_s27 = scalar_lea.hbm %s544_s5, 256 }
 0x1ce   :  { %p426_p13 = scmp.ne.s32.totalorder %s544_s5, %s425_s27  ;;  %p429_p0 = scmp.lt.u32.totalorder %s425_s27, %s544_s5 }
 0x1d0   :  { %p431_p1 = pnand %p429_p0, %p426_p13 }
 0x1d2   :  { %434 = shalt.err (!%p431_p1)
}
 0x1d3   :  { %311 = dma.vmem_to_hbm [thread:$0]  %s306_s25, 256, %s544_s5, [#allocation4], %s440_s28, %s440_s28, %s441_s29  }
 0x1d4   :  { %437 = dma.done.wait [#allocation4], 256  }
 0x1d5   :  { %438 = vsyncadd [#allocation4], 4294967040 }
 0x1d6   :  { %315 = vsyncpa [#allocation3], 1 }
 0x1d7   :  { %316 = vsyncpa [#allocation4], 1 }

</bundles_post_ra>
